<compile_context>
chip_gen: v7x
topology: tpu7x:2x2x1
jax: 0.10.0
libtpu: 0.0.40
codegen_flags: <defaults>
</compile_context>

<pallas_src>
import functools

import jax
import jax.numpy as jnp
from jax import lax
from jax.experimental import pallas as pl
from jax.experimental.pallas import tpu as pltpu

NEG = -1e30   # python float: a jnp scalar here would be captured as a kernel constant
LANE = 128    # lane width: output / hidden feature dims padded to this
SUB = 16      # bf16 sublane packing: first-layer contraction dim padded only to this


def _pad2(a, rows, cols):
    r, c = a.shape
    return jnp.pad(a, ((0, rows - r), (0, cols - c)))


def _vmem():
    return pl.BlockSpec(memory_space=pltpu.MemorySpace.VMEM)


# ---------------------------------------------------------------------------
# Fused forward kernel: all GATConv layers + mean-pool + MLP head + log_softmax
# ---------------------------------------------------------------------------
def _fused_gat_kernel(x_ref, bias_ref, w1_ref, as1_ref, ad1_ref,
                      ws_ref, ass_ref, ads_ref,
                      pool_ref, l1wt_ref, l2wt_ref, b2_ref,
                      out_ref, act_ref, *, num_extra):
    bias = bias_ref[...]                                            # [N, N] bf16 additive mask

    def gat_layer(x_bf16, w_bf16, a_src, a_dst):
        # h = x @ W  (bf16 MXU operands, f32 accumulate)
        h = jnp.dot(x_bf16, w_bf16, preferred_element_type=jnp.float32)        # [N, Hp] f32
        # attention terms in their natural layouts (no transpose):
        #   dst term via VPU mul + lane reduce, src term via one small dot_general
        a_d = jnp.sum(h * a_dst, axis=-1, keepdims=True)                        # [N, 1]
        a_s = lax.dot_general(a_src, h, (((1,), (1,)), ((), ())),
                              preferred_element_type=jnp.float32)               # [1, N]
        e = a_d + a_s                                                            # [N, N]
        e = jnp.maximum(e, 0.2 * e)                                              # LeakyReLU(0.2)
        logits = e + bias                                   # bf16 mask promotes to f32
        m = jnp.max(logits, axis=-1, keepdims=True)
        p = jnp.exp(logits - m)                              # TODO(synk): bf16 exp on v6e/v7x
        denom = jnp.sum(p, axis=-1, keepdims=True)
        # deferred softmax normalization: matmul first, scale the [N, Hp] result after
        o = jnp.dot(p.astype(jnp.bfloat16), h.astype(jnp.bfloat16),
                    preferred_element_type=jnp.float32)                          # [N, Hp]
        o = o * pl.reciprocal(denom, approx=True)
        return jnp.maximum(o, 0.0)                                               # ReLU

    # conv1 + ReLU -> VMEM-resident activation
    act_ref[...] = gat_layer(x_ref[...].astype(jnp.bfloat16), w1_ref[...],
                             as1_ref[...], ad1_ref[...])

    # remaining GATConv layers (+ ReLU; dropout == identity in eval)
    def body(l, carry):
        act_ref[...] = gat_layer(act_ref[...].astype(jnp.bfloat16), ws_ref[l],
                                 ass_ref[l], ads_ref[l])
        return carry

    lax.fori_loop(0, num_extra, body, 0, unroll=True)

    # global mean pool (pool[b, n] = 1/|G_b|) and MLP head (bf16 MXU operands, f32 acc)
    pooled = jnp.dot(pool_ref[...], act_ref[...].astype(jnp.bfloat16),
                     preferred_element_type=jnp.float32)                         # [B, Hp]
    hdn = jnp.maximum(jnp.dot(pooled.astype(jnp.bfloat16), l1wt_ref[...],
                              preferred_element_type=jnp.float32), 0.0)          # relu(lin1)
    y = jnp.dot(hdn.astype(jnp.bfloat16), l2wt_ref[...],
                preferred_element_type=jnp.float32) + b2_ref[...]                # lin2 (+bias;
    #                                          padded class columns carry a -1e30 mask)
    m = jnp.max(y, axis=-1, keepdims=True)
    z = y - m
    lse = jnp.log(jnp.sum(jnp.exp(z), axis=-1, keepdims=True))
    out_ref[...] = z - lse                                                       # log_softmax


# ---------------------------------------------------------------------------
# One-time parameter preparation: transposes + padding + bf16 casts (hoisted)
# ---------------------------------------------------------------------------
def prepare_params(params, f_in, hidden, classes):
    fp = max(SUB, ((f_in + SUB - 1) // SUB) * SUB)       # sublane multiple only (no 128 pad)
    hp = ((hidden + LANE - 1) // LANE) * LANE
    cp = ((classes + LANE - 1) // LANE) * LANE

    w1, a_s1, a_d1 = params["conv1"]
    convs = params["convs"]
    num_extra = len(convs)
    if num_extra:
        ws = jnp.stack([_pad2(w, hp, hp) for (w, _, _) in convs]).astype(jnp.bfloat16)
        ass = jnp.stack([_pad2(a_s, 1, hp) for (_, a_s, _) in convs])
        ads = jnp.stack([_pad2(a_d, 1, hp) for (_, _, a_d) in convs])
    else:  # dummy (never read: fori_loop runs 0 times)
        ws = jnp.zeros((1, hp, hp), jnp.bfloat16)
        ass = jnp.zeros((1, 1, hp), jnp.float32)
        ads = jnp.zeros((1, 1, hp), jnp.float32)

    # lin2 bias + additive class mask so the padded class columns vanish in log_softmax
    b2 = jnp.full((1, cp), NEG, jnp.float32).at[0, :classes].set(params["lin2_b"])

    prep = {
        "w1": _pad2(w1, fp, hp).astype(jnp.bfloat16),
        "a_src1": _pad2(a_s1, 1, hp),                    # tiny; kept f32 for VPU accuracy
        "a_dst1": _pad2(a_d1, 1, hp),
        "convs_w": ws,
        "convs_as": ass,
        "convs_ad": ads,
        "lin1_wt": _pad2(params["lin1_w"].T, hp, hp).astype(jnp.bfloat16),   # torch [out, in]
        "lin2_wt": _pad2(params["lin2_w"].T, hp, cp).astype(jnp.bfloat16),
        "lin2_b": b2,
    }
    return prep, num_extra, (fp, hp, cp)


# ---------------------------------------------------------------------------
# Forward wrapper (single fused pallas_call)
# ---------------------------------------------------------------------------
def gat_forward(x, adj, pool, prep, *, num_extra, num_classes, dims):
    fp, hp, cp = dims
    n, f_in = x.shape
    b = pool.shape[0]

    x_pad = _pad2(x.astype(jnp.float32), n, fp)
    bias = jnp.where(adj > 0, 0.0, NEG).astype(jnp.bfloat16)    # bf16 additive adjacency mask
    pool_bf = pool.astype(jnp.bfloat16)

    # vmem limit from the actual resident set (+ compiler temporaries for the [N,N] chain)
    prep_bytes = sum(int(v.size) * v.dtype.itemsize for v in jax.tree_util.tree_leaves(prep))
    resident = (x_pad.size * 4 + bias.size * 2 + pool_bf.size * 2 + prep_bytes
                + n * hp * 4 + b * cp * 4)
    nn_temps = 3 * n * n * 4                                    # e / p / logits f32 temps
    vmem_limit = int(min(max(2 * (resident + nn_temps), 16 << 20), 100 << 20))

    # advisory cost estimate so XLA schedules around the custom call sensibly
    layer_flops = 2 * n * hp * hp + 4 * n * hp + 2 * n * n * hp
    flops = (2 * n * fp * hp + 2 * n * n * hp) + num_extra * layer_flops \
        + 2 * b * n * hp + 2 * b * hp * hp + 2 * b * hp * cp
    trans = (1 + num_extra) * n * n + b * cp
    nbytes = resident

    kernel = functools.partial(_fused_gat_kernel, num_extra=num_extra)
    out = pl.pallas_call(
        kernel,
        out_shape=jax.ShapeDtypeStruct((b, cp), jnp.float32),
        in_specs=[_vmem()] * 12,
        out_specs=_vmem(),
        scratch_shapes=[pltpu.VMEM((n, hp), jnp.float32)],      # VMEM-resident activation
        compiler_params=pltpu.CompilerParams(vmem_limit_bytes=vmem_limit),
        cost_estimate=pl.CostEstimate(flops=int(flops), transcendentals=int(trans),
                                      bytes_accessed=int(nbytes)),
        # TODO(synk): for large N, switch to a row-block ("parallel",) grid with
        # flash-style online softmax over key blocks (v7x dual-TC + VMEM scaling),
        # and stream convs_w from HBM via make_async_copy for deep stacks.
    )(x_pad, bias, prep["w1"], prep["a_src1"], prep["a_dst1"],
      prep["convs_w"], prep["convs_as"], prep["convs_ad"],
      pool_bf, prep["lin1_wt"], prep["lin2_wt"], prep["lin2_b"])
    return out[:, :num_classes]


if __name__ == "__main__":
    # small, forward-consistent shapes
    N = 16            # nodes
    F_IN = 8          # dataset.num_features
    HIDDEN = 32       # hidden
    CLASSES = 4       # dataset.num_classes
    NUM_LAYERS = 2    # conv1 + 1 extra GATConv
    B = 2             # graphs in the batch

    key = jax.random.PRNGKey(0)
    keys = jax.random.split(key, 16)

    # node features
    x = jax.random.normal(keys[0], (N, F_IN), jnp.float32)

    # edge_index: bidirectional ring; adjacency adj[i, j] = 1 iff edge j -> i
    src = jnp.concatenate([jnp.arange(N), (jnp.arange(N) + 1) % N])
    dst = jnp.concatenate([(jnp.arange(N) + 1) % N, jnp.arange(N)])
    adj = jnp.zeros((N, N), jnp.float32).at[dst, src].set(1.0)
    adj = jnp.maximum(adj, jnp.eye(N, dtype=jnp.float32))       # add_self_loops=True

    # batch assignment: first half graph 0, second half graph 1 -> mean-pool matrix
    # NOTE: several graphs share one block-diagonal adjacency, so one kernel call
    # handles a whole batch (fills MXU rows at real sizes).
    batch = jnp.concatenate([jnp.zeros(N // 2, jnp.int32), jnp.ones(N // 2, jnp.int32)])
    one_hot = (batch[None, :] == jnp.arange(B)[:, None]).astype(jnp.float32)   # [B, N]
    pool = one_hot / jnp.sum(one_hot, axis=1, keepdims=True)

    def _glorot(k, shape):
        fan_in, fan_out = shape[0], shape[-1]
        limit = jnp.sqrt(6.0 / (fan_in + fan_out))
        return jax.random.uniform(k, shape, jnp.float32, -limit, limit)

    # deterministic parameter init (synthetic; no checkpoint)
    params = {
        "conv1": (
            _glorot(keys[1], (F_IN, HIDDEN)),            # GATConv lin weight (pre-transposed)
            _glorot(keys[2], (1, HIDDEN)),               # att_src
            _glorot(keys[3], (1, HIDDEN)),               # att_dst
        ),
        "convs": [
            (
                _glorot(keys[4 + 3 * i], (HIDDEN, HIDDEN)),
                _glorot(keys[5 + 3 * i], (1, HIDDEN)),
                _glorot(keys[6 + 3 * i], (1, HIDDEN)),
            )
            for i in range(NUM_LAYERS - 1)
        ],
        "lin1_w": _glorot(keys[10], (HIDDEN, HIDDEN)),   # torch Linear weight [out, in]
        "lin2_w": _glorot(keys[11], (CLASSES, HIDDEN)),  # torch Linear weight [out, in]
        "lin2_b": jax.random.normal(keys[12], (CLASSES,), jnp.float32) * 0.01,
    }

    prep, num_extra, dims = prepare_params(params, F_IN, HIDDEN, CLASSES)

    fwd = jax.jit(functools.partial(gat_forward, num_extra=num_extra,
                                    num_classes=CLASSES, dims=dims))
    out = fwd(x, adj, pool, prep)
    out = jax.block_until_ready(out)

    assert out.shape == (B, CLASSES)
    assert bool(jnp.all(jnp.isfinite(out)))
    # rows of log_softmax must exp-sum to 1
    assert bool(jnp.allclose(jnp.exp(out).sum(-1), 1.0, atol=1e-5))
    print("KERNEL_OK")
</pallas_src>

<mosaic_0001>
module attributes {stable_mosaic.version = 11 : i64} {
  func.func @_fused_gat_kernel(%arg0: memref<16x16xf32, #tpu.memory_space<vmem>>, %arg1: memref<16x16xbf16, #tpu.memory_space<vmem>>, %arg2: memref<16x128xbf16, #tpu.memory_space<vmem>>, %arg3: memref<1x128xf32, #tpu.memory_space<vmem>>, %arg4: memref<1x128xf32, #tpu.memory_space<vmem>>, %arg5: memref<1x128x128xbf16, #tpu.memory_space<vmem>>, %arg6: memref<1x1x128xf32, #tpu.memory_space<vmem>>, %arg7: memref<1x1x128xf32, #tpu.memory_space<vmem>>, %arg8: memref<2x16xbf16, #tpu.memory_space<vmem>>, %arg9: memref<128x128xbf16, #tpu.memory_space<vmem>>, %arg10: memref<128x128xbf16, #tpu.memory_space<vmem>>, %arg11: memref<1x128xf32, #tpu.memory_space<vmem>>, %arg12: memref<2x128xf32, #tpu.memory_space<vmem>>, %arg13: memref<16x128xf32, #tpu.memory_space<vmem>>) attributes {dimension_semantics = [], scalar_prefetch = 0 : i64, scratch_operands = 1 : i64, tpu.core_type = #tpu.core_type<tc>} {
    %c0 = arith.constant 0 : index
    %c0_0 = arith.constant 0 : index
    %0 = vector.load %arg1[%c0, %c0_0] : memref<16x16xbf16, #tpu.memory_space<vmem>>, vector<16x16xbf16>
    %c0_1 = arith.constant 0 : index
    %c0_2 = arith.constant 0 : index
    %1 = vector.load %arg0[%c0_1, %c0_2] : memref<16x16xf32, #tpu.memory_space<vmem>>, vector<16x16xf32>
    %2 = arith.truncf %1 : vector<16x16xf32> to vector<16x16xbf16>
    %c0_3 = arith.constant 0 : index
    %c0_4 = arith.constant 0 : index
    %3 = vector.load %arg2[%c0_3, %c0_4] : memref<16x128xbf16, #tpu.memory_space<vmem>>, vector<16x128xbf16>
    %c0_5 = arith.constant 0 : index
    %c0_6 = arith.constant 0 : index
    %4 = vector.load %arg3[%c0_5, %c0_6] : memref<1x128xf32, #tpu.memory_space<vmem>>, vector<1x128xf32>
    %c0_7 = arith.constant 0 : index
    %c0_8 = arith.constant 0 : index
    %5 = vector.load %arg4[%c0_7, %c0_8] : memref<1x128xf32, #tpu.memory_space<vmem>>, vector<1x128xf32>
    %cst = arith.constant dense<0.000000e+00> : vector<16x128xf32>
    %6 = tpu.matmul %2, %3, %cst {dimension_numbers = #tpu.dot_dimension_numbers<[1], [0], [0], [1], [0, 0, 1, 1], [], []>} : vector<16x16xbf16>, vector<16x128xbf16>, vector<16x128xf32> -> vector<16x128xf32>
    %7 = vector.broadcast %5 : vector<1x128xf32> to vector<16x128xf32>
    %8 = arith.mulf %6, %7 : vector<16x128xf32>
    %cst_9 = arith.constant dense<0.000000e+00> : vector<16xf32>
    %9 = vector.multi_reduction <add>, %8, %cst_9 [1] : vector<16x128xf32> to vector<16xf32>
    %10 = vector.shape_cast %9 : vector<16xf32> to vector<16x1xf32>
    %cst_10 = arith.constant dense<0.000000e+00> : vector<1x16xf32>
    %11 = tpu.matmul %4, %6, %cst_10 {dimension_numbers = #tpu.dot_dimension_numbers<[1], [1], [0], [0], [0, 0, 1, 0], [], []>} : vector<1x128xf32>, vector<16x128xf32>, vector<1x16xf32> -> vector<1x16xf32>
    %12 = vector.broadcast %10 : vector<16x1xf32> to vector<16x16xf32>
    %13 = vector.broadcast %11 : vector<1x16xf32> to vector<16x16xf32>
    %14 = arith.addf %12, %13 : vector<16x16xf32>
    %cst_11 = arith.constant 2.000000e-01 : f32
    %15 = vector.broadcast %cst_11 : f32 to vector<16x16xf32>
    %16 = arith.mulf %15, %14 : vector<16x16xf32>
    %17 = arith.maximumf %14, %16 : vector<16x16xf32>
    %18 = arith.extf %0 : vector<16x16xbf16> to vector<16x16xf32>
    %19 = arith.addf %17, %18 : vector<16x16xf32>
    %cst_12 = arith.constant dense<0xFF800000> : vector<16xf32>
    %20 = vector.multi_reduction <maximumf>, %19, %cst_12 [1] : vector<16x16xf32> to vector<16xf32>
    %21 = vector.shape_cast %20 : vector<16xf32> to vector<16x1xf32>
    %22 = vector.broadcast %21 : vector<16x1xf32> to vector<16x16xf32>
    %23 = arith.subf %19, %22 : vector<16x16xf32>
    %24 = math.exp %23 : vector<16x16xf32>
    %cst_13 = arith.constant dense<0.000000e+00> : vector<16xf32>
    %25 = vector.multi_reduction <add>, %24, %cst_13 [1] : vector<16x16xf32> to vector<16xf32>
    %26 = vector.shape_cast %25 : vector<16xf32> to vector<16x1xf32>
    %27 = arith.truncf %24 : vector<16x16xf32> to vector<16x16xbf16>
    %28 = arith.truncf %6 : vector<16x128xf32> to vector<16x128xbf16>
    %cst_14 = arith.constant dense<0.000000e+00> : vector<16x128xf32>
    %29 = tpu.matmul %27, %28, %cst_14 {dimension_numbers = #tpu.dot_dimension_numbers<[1], [0], [0], [1], [0, 0, 1, 1], [], []>} : vector<16x16xbf16>, vector<16x128xbf16>, vector<16x128xf32> -> vector<16x128xf32>
    %30 = tpu.reciprocal %26 {approx = true} : vector<16x1xf32> -> vector<16x1xf32>
    %31 = vector.broadcast %30 : vector<16x1xf32> to vector<16x128xf32>
    %32 = arith.mulf %29, %31 : vector<16x128xf32>
    %cst_15 = arith.constant 0.000000e+00 : f32
    %33 = vector.broadcast %cst_15 : f32 to vector<16x128xf32>
    %34 = arith.maximumf %32, %33 : vector<16x128xf32>
    %c0_16 = arith.constant 0 : index
    %c0_17 = arith.constant 0 : index
    %35 = vector.load %arg13[%c0_16, %c0_17] : memref<16x128xf32, #tpu.memory_space<vmem>>, vector<16x128xf32>
    tpu.vector_store %arg13[%c0_16, %c0_17], %34 {strides = array<i32>} : memref<16x128xf32, #tpu.memory_space<vmem>>, vector<16x128xf32>,
    %c0_i32 = arith.constant 0 : i32
    %c0_18 = arith.constant 0 : index
    %c0_19 = arith.constant 0 : index
    %36 = vector.load %arg13[%c0_18, %c0_19] : memref<16x128xf32, #tpu.memory_space<vmem>>, vector<16x128xf32>
    %37 = arith.truncf %36 : vector<16x128xf32> to vector<16x128xbf16>
    %38 = arith.index_cast %c0_i32 : i32 to index
    %c0_20 = arith.constant 0 : index
    %c0_21 = arith.constant 0 : index
    %39 = vector.load %arg5[%38, %c0_20, %c0_21] : memref<1x128x128xbf16, #tpu.memory_space<vmem>>, vector<1x128x128xbf16>
    %40 = vector.shape_cast %39 : vector<1x128x128xbf16> to vector<128x128xbf16>
    %41 = arith.index_cast %c0_i32 : i32 to index
    %c0_22 = arith.constant 0 : index
    %c0_23 = arith.constant 0 : index
    %42 = vector.load %arg6[%41, %c0_22, %c0_23] : memref<1x1x128xf32, #tpu.memory_space<vmem>>, vector<1x1x128xf32>
    %43 = vector.shape_cast %42 : vector<1x1x128xf32> to vector<1x128xf32>
    %44 = arith.index_cast %c0_i32 : i32 to index
    %c0_24 = arith.constant 0 : index
    %c0_25 = arith.constant 0 : index
    %45 = vector.load %arg7[%44, %c0_24, %c0_25] : memref<1x1x128xf32, #tpu.memory_space<vmem>>, vector<1x1x128xf32>
    %46 = vector.shape_cast %45 : vector<1x1x128xf32> to vector<1x128xf32>
    %cst_26 = arith.constant dense<0.000000e+00> : vector<16x128xf32>
    %47 = tpu.matmul %37, %40, %cst_26 {dimension_numbers = #tpu.dot_dimension_numbers<[1], [0], [0], [1], [0, 0, 1, 1], [], []>} : vector<16x128xbf16>, vector<128x128xbf16>, vector<16x128xf32> -> vector<16x128xf32>
    %48 = vector.broadcast %46 : vector<1x128xf32> to vector<16x128xf32>
    %49 = arith.mulf %47, %48 : vector<16x128xf32>
    %cst_27 = arith.constant dense<0.000000e+00> : vector<16xf32>
    %50 = vector.multi_reduction <add>, %49, %cst_27 [1] : vector<16x128xf32> to vector<16xf32>
    %51 = vector.shape_cast %50 : vector<16xf32> to vector<16x1xf32>
    %cst_28 = arith.constant dense<0.000000e+00> : vector<1x16xf32>
    %52 = tpu.matmul %43, %47, %cst_28 {dimension_numbers = #tpu.dot_dimension_numbers<[1], [1], [0], [0], [0, 0, 1, 0], [], []>} : vector<1x128xf32>, vector<16x128xf32>, vector<1x16xf32> -> vector<1x16xf32>
    %53 = vector.broadcast %51 : vector<16x1xf32> to vector<16x16xf32>
    %54 = vector.broadcast %52 : vector<1x16xf32> to vector<16x16xf32>
    %55 = arith.addf %53, %54 : vector<16x16xf32>
    %cst_29 = arith.constant 2.000000e-01 : f32
    %56 = vector.broadcast %cst_29 : f32 to vector<16x16xf32>
    %57 = arith.mulf %56, %55 : vector<16x16xf32>
    %58 = arith.maximumf %55, %57 : vector<16x16xf32>
    %59 = arith.extf %0 : vector<16x16xbf16> to vector<16x16xf32>
    %60 = arith.addf %58, %59 : vector<16x16xf32>
    %cst_30 = arith.constant dense<0xFF800000> : vector<16xf32>
    %61 = vector.multi_reduction <maximumf>, %60, %cst_30 [1] : vector<16x16xf32> to vector<16xf32>
    %62 = vector.shape_cast %61 : vector<16xf32> to vector<16x1xf32>
    %63 = vector.broadcast %62 : vector<16x1xf32> to vector<16x16xf32>
    %64 = arith.subf %60, %63 : vector<16x16xf32>
    %65 = math.exp %64 : vector<16x16xf32>
    %cst_31 = arith.constant dense<0.000000e+00> : vector<16xf32>
    %66 = vector.multi_reduction <add>, %65, %cst_31 [1] : vector<16x16xf32> to vector<16xf32>
    %67 = vector.shape_cast %66 : vector<16xf32> to vector<16x1xf32>
    %68 = arith.truncf %65 : vector<16x16xf32> to vector<16x16xbf16>
    %69 = arith.truncf %47 : vector<16x128xf32> to vector<16x128xbf16>
    %cst_32 = arith.constant dense<0.000000e+00> : vector<16x128xf32>
    %70 = tpu.matmul %68, %69, %cst_32 {dimension_numbers = #tpu.dot_dimension_numbers<[1], [0], [0], [1], [0, 0, 1, 1], [], []>} : vector<16x16xbf16>, vector<16x128xbf16>, vector<16x128xf32> -> vector<16x128xf32>
    %71 = tpu.reciprocal %67 {approx = true} : vector<16x1xf32> -> vector<16x1xf32>
    %72 = vector.broadcast %71 : vector<16x1xf32> to vector<16x128xf32>
    %73 = arith.mulf %70, %72 : vector<16x128xf32>
    %cst_33 = arith.constant 0.000000e+00 : f32
    %74 = vector.broadcast %cst_33 : f32 to vector<16x128xf32>
    %75 = arith.maximumf %73, %74 : vector<16x128xf32>
    %c0_34 = arith.constant 0 : index
    %c0_35 = arith.constant 0 : index
    %76 = vector.load %arg13[%c0_34, %c0_35] : memref<16x128xf32, #tpu.memory_space<vmem>>, vector<16x128xf32>
    tpu.vector_store %arg13[%c0_34, %c0_35], %75 {strides = array<i32>} : memref<16x128xf32, #tpu.memory_space<vmem>>, vector<16x128xf32>,
    %c1_i32 = arith.constant 1 : i32
    %c0_36 = arith.constant 0 : index
    %c0_37 = arith.constant 0 : index
    %77 = vector.load %arg8[%c0_36, %c0_37] : memref<2x16xbf16, #tpu.memory_space<vmem>>, vector<2x16xbf16>
    %c0_38 = arith.constant 0 : index
    %c0_39 = arith.constant 0 : index
    %78 = vector.load %arg13[%c0_38, %c0_39] : memref<16x128xf32, #tpu.memory_space<vmem>>, vector<16x128xf32>
    %79 = arith.truncf %78 : vector<16x128xf32> to vector<16x128xbf16>
    %cst_40 = arith.constant dense<0.000000e+00> : vector<2x128xf32>
    %80 = tpu.matmul %77, %79, %cst_40 {dimension_numbers = #tpu.dot_dimension_numbers<[1], [0], [0], [1], [0, 0, 1, 1], [], []>} : vector<2x16xbf16>, vector<16x128xbf16>, vector<2x128xf32> -> vector<2x128xf32>
    %81 = arith.truncf %80 : vector<2x128xf32> to vector<2x128xbf16>
    %c0_41 = arith.constant 0 : index
    %c0_42 = arith.constant 0 : index
    %82 = vector.load %arg9[%c0_41, %c0_42] : memref<128x128xbf16, #tpu.memory_space<vmem>>, vector<128x128xbf16>
    %cst_43 = arith.constant dense<0.000000e+00> : vector<2x128xf32>
    %83 = tpu.matmul %81, %82, %cst_43 {dimension_numbers = #tpu.dot_dimension_numbers<[1], [0], [0], [1], [0, 0, 1, 1], [], []>} : vector<2x128xbf16>, vector<128x128xbf16>, vector<2x128xf32> -> vector<2x128xf32>
    %cst_44 = arith.constant 0.000000e+00 : f32
    %84 = vector.broadcast %cst_44 : f32 to vector<2x128xf32>
    %85 = arith.maximumf %83, %84 : vector<2x128xf32>
    %86 = arith.truncf %85 : vector<2x128xf32> to vector<2x128xbf16>
    %c0_45 = arith.constant 0 : index
    %c0_46 = arith.constant 0 : index
    %87 = vector.load %arg10[%c0_45, %c0_46] : memref<128x128xbf16, #tpu.memory_space<vmem>>, vector<128x128xbf16>
    %cst_47 = arith.constant dense<0.000000e+00> : vector<2x128xf32>
    %88 = tpu.matmul %86, %87, %cst_47 {dimension_numbers = #tpu.dot_dimension_numbers<[1], [0], [0], [1], [0, 0, 1, 1], [], []>} : vector<2x128xbf16>, vector<128x128xbf16>, vector<2x128xf32> -> vector<2x128xf32>
    %c0_48 = arith.constant 0 : index
    %c0_49 = arith.constant 0 : index
    %89 = vector.load %arg11[%c0_48, %c0_49] : memref<1x128xf32, #tpu.memory_space<vmem>>, vector<1x128xf32>
    %90 = vector.broadcast %89 : vector<1x128xf32> to vector<2x128xf32>
    %91 = arith.addf %88, %90 : vector<2x128xf32>
    %cst_50 = arith.constant dense<0xFF800000> : vector<2xf32>
    %92 = vector.multi_reduction <maximumf>, %91, %cst_50 [1] : vector<2x128xf32> to vector<2xf32>
    %93 = vector.shape_cast %92 : vector<2xf32> to vector<2x1xf32>
    %94 = vector.broadcast %93 : vector<2x1xf32> to vector<2x128xf32>
    %95 = arith.subf %91, %94 : vector<2x128xf32>
    %96 = math.exp %95 : vector<2x128xf32>
    %cst_51 = arith.constant dense<0.000000e+00> : vector<2xf32>
    %97 = vector.multi_reduction <add>, %96, %cst_51 [1] : vector<2x128xf32> to vector<2xf32>
    %98 = vector.shape_cast %97 : vector<2xf32> to vector<2x1xf32>
    %99 = math.log %98 : vector<2x1xf32>
    %100 = vector.broadcast %99 : vector<2x1xf32> to vector<2x128xf32>
    %101 = arith.subf %95, %100 : vector<2x128xf32>
    %c0_52 = arith.constant 0 : index
    %c0_53 = arith.constant 0 : index
    %102 = vector.load %arg12[%c0_52, %c0_53] : memref<2x128xf32, #tpu.memory_space<vmem>>, vector<2x128xf32>
    tpu.vector_store %arg12[%c0_52, %c0_53], %101 {strides = array<i32>} : memref<2x128xf32, #tpu.memory_space<vmem>>, vector<2x128xf32>,
    return
  }
}

</mosaic_0001>

<bundles_post_ra>
// kernel: gat_forward.1
= control target key start
LH: loop header
LB: loop body
LE: loop exit
PB: predicated region body
PF: predicated region fallthrough
CT: control target
= control target key end

     0   :  { %17 = vsyncpa [#allocation4], 0  ;;  %s1416_s0 = inlined_call_operand.vmem [shape: f32[16,16], index: 0, kind: input, shape index: {}]   ;;  %s1417_s1 = inlined_call_operand.vmem [shape: bf16[16,16], index: 1, kind: input, shape index: {}]   ;;  %s1418_s2 = inlined_call_operand.vmem [shape: bf16[16,128], index: 2, kind: input, shape index: {}]   ;;  %s1419_s3 = inlined_call_operand.vmem [shape: f32[1,128], index: 3, kind: input, shape index: {}]   ;;  %s1420_s4 = inlined_call_operand.vmem [shape: f32[1,128], index: 4, kind: input, shape index: {}]   ;;  %s1421_s5 = inlined_call_operand.vmem [shape: bf16[1,128,128], index: 5, kind: input, shape index: {}]   ;;  %s1422_s6 = inlined_call_operand.vmem [shape: f32[1,1,128], index: 6, kind: input, shape index: {}]   ;;  %s1423_s7 = inlined_call_operand.vmem [shape: f32[1,1,128], index: 7, kind: input, shape index: {}]   ;;  %s1424_s8 = inlined_call_operand.vmem [shape: bf16[2,16], index: 8, kind: input, shape index: {}]   ;;  %s1425_s9 = inlined_call_operand.hbm [shape: bf16[128,128], index: 9, kind: input, shape index: {}]   ;;  %s1426_s10 = inlined_call_operand.hbm [shape: bf16[128,128], index: 10, kind: input, shape index: {}]   ;;  %s1427_s11 = inlined_call_operand.vmem [shape: f32[1,128], index: 11, kind: input, shape index: {}]   ;;  %s1428_s12 = inlined_call_operand.hbm [shape: f32[2,128], index: 12, kind: output, shape index: {}]  }
   0x1   :  { %18 = vsyncpa [#allocation7], 0 }
   0x2   :  { %19 = vsyncpa [#allocation5], 0  ;;  %s1176_s21 = smov [#allocation3]   ;;  %s1104_s25 = scalar_lea.hbm %s1425_s9, 1024 }
   0x3   :  { %s43_s22 = sshll.u32 %s1176_s21, 4  ;;  %p1105_p0 = scmp.ne.s32.totalorder %s1425_s9, %s1104_s25  ;;  %s44_s22 = int_to_ptr.vmem [resolvable:$true] %s43_s22 }
   0x4   :  { %p1108_p1 = scmp.lt.u32.totalorder %s1104_s25, %s1425_s9 }
   0x6   :  { %p1110_p2 = pnand %p1108_p1, %p1105_p0 }
   0x8   :  { %1113 = shalt.err (!%p1110_p2)
}
   0x9   :  { %s1114_s30 = scalar_lea.vmem %s44_s22, 1024  ;;  %p1119_p4 = scmp.lt.s32.totalorder %s44_s22, %s44_s22 }
   0xa   :  { %p1115_p3 = scmp.ne.s32.totalorder %s44_s22, %s1114_s30  ;;  %p1120_p5 = scmp.lt.s32.totalorder %s1114_s30, %s1114_s30 }
   0xc   :  { %p1121_p6 = por %p1120_p5, %p1119_p4 }
   0xe   :  { %p1122_p7 = pnand %p1121_p6, %p1115_p3 }
  0x10   :  { %1125 = shalt.err (!%p1122_p7)
}
  0x11   :  { %s1177_s13 = smov 64   ;;  %s1178_s14 = smov 4  }
  0x12   :  { %49 = dma.hbm_to_vmem [thread:$0]  %s1425_s9, 1024, %s44_s22, [#allocation4], %s1177_s13, %s1177_s13, %s1178_s14  }
  0x13   :  { %s1179_s17 = smov [#allocation6]   ;;  %s1126_s21 = scalar_lea.hbm %s1426_s10, 1024 }
  0x14   :  { %s55_s18 = sshll.u32 %s1179_s17, 4  ;;  %p1127_p8 = scmp.ne.s32.totalorder %s1426_s10, %s1126_s21  ;;  %s56_s18 = int_to_ptr.vmem [resolvable:$true] %s55_s18 }
  0x15   :  { %p1130_p9 = scmp.lt.u32.totalorder %s1126_s21, %s1426_s10 }
  0x17   :  { %p1132_p10 = pnand %p1130_p9, %p1127_p8 }
  0x19   :  { %1135 = shalt.err (!%p1132_p10)
}
  0x1a   :  { %s1136_s27 = scalar_lea.vmem %s56_s18, 1024  ;;  %p1141_p12 = scmp.lt.s32.totalorder %s56_s18, %s56_s18 }
  0x1b   :  { %p1137_p11 = scmp.ne.s32.totalorder %s56_s18, %s1136_s27  ;;  %p1142_p13 = scmp.lt.s32.totalorder %s1136_s27, %s1136_s27 }
  0x1d   :  { %p1143_p0 = por %p1142_p13, %p1141_p12 }
  0x1f   :  { %p1144_p1 = pnand %p1143_p0, %p1137_p11 }
  0x21   :  { %1147 = shalt.err (!%p1144_p1)
}
  0x22   :  { %61 = dma.hbm_to_vmem [thread:$0]  %s1426_s10, 1024, %s56_s18, [#allocation7], %s1177_s13, %s1177_s13, %s1178_s14  }
  0x23   :  { %1170 = dma.done.wait [#allocation4], 1024  }
  0x24   :  { %1171 = vsyncadd [#allocation4], 4294966272 }
  0x25   :  { %1172 = dma.done.wait [#allocation7], 1024  }
  0x26   :  { %1173 = vsyncadd [#allocation7], 4294966272  ;;  %v1180_v0 = vmov 0.0   ;;  %vm1181_vm0 = vmmov 0   ;;  %v1059_v1 = vld [vmem:[%s1418_s2] sm:$0xff]   ;;  %v74_v3 = vld [vmem:[%s1416_s0 + $0x8] sm:$0xff]  ;;  %v213_v15 = vlaneseq }
  0x27   :  { %947 = vmatprep.subr.bf16.mxu0 %v1180_v0  ;;  %949 = vmatprep.mubr.msk.bf16.mxu0 %vm1181_vm0, %v1180_v0  ;;  %v73_v2 = vld [vmem:[%s1416_s0] sm:$0xff]  ;;  %vm86_vm1 = vcmask 130048   ;;  %v1182_v5 = vmov 0.0|0.0   ;;  %v1061_v48 = vld [vmem:[%s1421_s5 + $0x8] sm:$0xff]   ;;  %v1062_v49 = vld [vmem:[%s1421_s5 + $0x10] sm:$0xff]   ;;  %vm840_vm2 = vcmask 1041408  }
  0x28   :  { %966 = vmatprep.subr.bf16.mxu1 %v1180_v0  ;;  %982 = vmatprep.mubr.msk.bf16.mxu1 %vm1181_vm0, %v1180_v0  ;;  %v75_v4 = vpack.c.bf16 %v74_v3, %v73_v2  ;;  %v872_v6 = vld [vmem:[%s1420_s4] ss:$0 sm:$0xff]  ;;  %v1300_v16 = vshrl.u32 %v213_v15, 7  ;;  %v1063_v50 = vld [vmem:[%s1421_s5 + $0x18] sm:$0xff]   ;;  %v1065_v52 = vld [vmem:[%s1421_s5 + $0x28] sm:$0xff]   ;;  %s1183_s2 = smov [#allocation8]  }
  0x29   :  { %948 = vmatpush3.bf16.msra.mxu0 %v1059_v1  ;;  %v78_v14 = vld [vmem:[%s1419_s3] sm:$0x1]  ;;  %v1066_v53 = vld [vmem:[%s1421_s5 + $0x30] sm:$0xff]   ;;  %v1067_v54 = vld [vmem:[%s1421_s5 + $0x38] sm:$0xff]  }
  0x2a   :  { %1045 = vmatprep.subr.bf16.mxu0 %v1182_v5  ;;  %v215_v18 = vsub.s32 0, %v1300_v16  ;;  %v1308_v23 = vld [vmem:[%s1417_s1] sm:$0xff]  }
  0x2b   :  { %v904_v28 = vunpack.c.l.bf16 %v1308_v23  ;;  %v905_v30 = vunpack.c.h.bf16 %v1308_v23  ;;  %v1060_v47 = vld [vmem:[%s1421_s5] sm:$0xff]  }
  0x2c   :  { %950 = vmatmul.mubr.msk.bf16.vlgmr.msra.gmra.mrb[0].mxu0 %vm86_vm1, %v75_v4  ;;  %967 = vmatpush3.bf16.msra.mxu1 %v1060_v47  ;;  %v1064_v51 = vld [vmem:[%s1421_s5 + $0x20] sm:$0xff]  }
  0x2d   :  { %957 = vmatprep.mubr.msk.f32.mxu0 %vm1181_vm0, %v1180_v0  ;;  %968 = vmatprep.subr.bf16.mxu1 %v1180_v0 }
  0x30   :  { %969 = vmatpush3.bf16.msra.mxu1 %v1061_v48 }
  0x31   :  { %970 = vmatprep.subr.bf16.mxu1 %v1180_v0 }
  0x34   :  { %971 = vmatpush3.bf16.msra.mxu1 %v1062_v49 }
  0x35   :  { %972 = vmatprep.subr.bf16.mxu1 %v1180_v0 }
  0x38   :  { %973 = vmatpush3.bf16.msra.mxu1 %v1063_v50 }
  0x39   :  { %974 = vmatprep.subr.bf16.mxu1 %v1180_v0 }
  0x3c   :  { %975 = vmatpush3.bf16.msra.mxu1 %v1064_v51 }
  0x3d   :  { %976 = vmatprep.subr.bf16.mxu1 %v1180_v0 }
  0x40   :  { %977 = vmatpush3.bf16.msra.mxu1 %v1065_v52 }
  0x41   :  { %978 = vmatprep.subr.bf16.mxu1 %v1180_v0 }
  0x44   :  { %979 = vmatpush3.bf16.msra.mxu1 %v1066_v53  ;;  %v575_v53 = vld [vmem:[%s1424_s8] sm:$0x1] }
  0x45   :  { %980 = vmatprep.subr.bf16.mxu1 %v1180_v0 }
  0x48   :  { %981 = vmatpush3.bf16.msra.mxu1 %v1067_v54  ;;  %v1068_v54 = vld [vmem:[#allocation3] sm:$0xff]  }
  0x49   :  { %1025 = vmatprep.subr.bf16.mxu1 %v1180_v0 }
  0xff   :  { %v124_v7 = vpop.f32.mrb[0].mxu0 }
 0x100   :  { %v951_v8 = vpop.f32.mrb[1].mxu0  ;;  %v137_v9 = vmul.f32 %v872_v6, %v124_v7 }
 0x101   :  { %v127_v10 = vpop.f32.mrb[2].mxu0 }
 0x102   :  { %v1046_v11 = vpack.c.bf16 %v127_v10, %v124_v7  ;;  %139 = vadd.xlane.f32.xlu0 %v137_v9  ;;  %v952_v12 = vpop.f32.mrb[3].mxu0  ;;  %v138_v13 = vmul.f32 %v872_v6, %v127_v10 }
 0x104   :  { %1047 = vmatpush3.bf16.xpose.msra.mxu0 %v1046_v11 }
 0x105   :  { %960 = vmatprep.subr.bf16.mxu0 %v1180_v0 }
 0x106   :  { %141 = vadd.xlane.f32.xlu0 %v138_v13  ;;  %v318_v13 = vld [vmem:[%s1422_s6] sm:$0x1] }
 0x10b   :  { %958 = vmatmul.mubr.f32.vlgmr.msra.gmra.mrb[4].mxu0 %v78_v14 }
 0x10c   :  { %961 = vmatpush3.bf16.msra.mxu0 %v1046_v11  ;;  %962 = vmatprep.mubr.msk.bf16.mxu0 %vm1181_vm0, %v1180_v0 }
 0x10d   :  { %1048 = vmatprep.subr.bf16.mxu0 %v1182_v5  ;;  %v882_v5 = vld [vmem:[%s1423_s7] ss:$0 sm:$0xff] }
 0x18f   :  { %v140_v17 = vpop.xlane.xlu0 %139 }
 0x193   :  { %v142_v22 = vpop.xlane.xlu0 %141 }
 0x1de   :  { %v209_v19 = vpop.f32.mrb[4].mxu0 }
 0x1df   :  { %v216_v20 = vrot.slane %v209_v19, %v215_v18  ;;  %v959_v21 = vpop.f32.mrb[5].mxu0 }
 0x1e1   :  { %v217_v24 = vadd.f32 %v216_v20, %v140_v17  ;;  %v218_v25 = vadd.f32 %v216_v20, %v142_v22 }
 0x1e3   :  { %v219_v26 = vmul.f32 0.2, %v217_v24  ;;  %v220_v27 = vmul.f32 0.2, %v218_v25 }
 0x1e5   :  { %v221_v29 = vmax.f32 %v217_v24, %v219_v26  ;;  %v222_v31 = vmax.f32 %v218_v25, %v220_v27 }
 0x1e7   :  { %v225_v32 = vadd.f32 %v904_v28, %v221_v29  ;;  %v226_v34 = vadd.f32 %v905_v30, %v222_v31 }
 0x1e9   :  { %v227_v33 = vsel %vm86_vm1, %v225_v32, -inf  ;;  %v230_v35 = vsel %vm86_vm1, %v226_v34, -inf }
 0x1ea   :  { %228 = vmax.xlane.f32.xlu1 %v227_v33 }
 0x1ee   :  { %231 = vmax.xlane.f32.xlu1 %v230_v35 }
 0x277   :  { %v229_v36 = vpop.xlane.xlu1 %228 }
 0x278   :  { %v233_v37 = vsub.f32 %v225_v32, %v229_v36 }
 0x27a   :  { %v235_v38 = vmul.f32 1.442695, %v233_v37 }
 0x27b   :  { %v232_v39 = vpop.xlane.xlu1 %231 }
 0x27c   :  { %1084 = vpow2.f32 %v235_v38  ;;  %v234_v40 = vsub.f32 %v226_v34, %v232_v39 }
 0x27e   :  { %v237_v41 = vmul.f32 1.442695, %v234_v40 }
 0x280   :  { %1086 = vpow2.f32 %v237_v41 }
 0x286   :  { %v1085_v42 = vpop.eup %1084 }
 0x287   :  { %v239_v43 = vsel %vm86_vm1, %v1085_v42, 0.0 }
 0x288   :  { %240 = vadd.xlane.f32.xlu0 %v239_v43 }
 0x28a   :  { %v1087_v44 = vpop.eup %1086 }
 0x28b   :  { %v242_v45 = vsel %vm86_vm1, %v1087_v44, 0.0  ;;  %v245_v46 = vpack.c.bf16 %v1087_v44, %v1085_v42 }
 0x28c   :  { %243 = vadd.xlane.f32.xlu1 %v242_v45 }
 0x28d   :  { %963 = vmatmul.mubr.msk.bf16.vlgmr.msra.gmra.mrb[8].mxu0 %vm86_vm1, %v245_v46 }
 0x28e   :  { %990 = vmatprep.mubr.msk.f32.mxu0 %vm1181_vm0, %v1180_v0 }
 0x315   :  { %v241_v55 = vpop.xlane.xlu0 %240 }
 0x316   :  { %1088 = vrcp.f32 %v241_v55  ;;  %v1069_v55 = vld [vmem:[#allocation3 + $0x8] sm:$0xff]  }
 0x319   :  { %v244_v56 = vpop.xlane.xlu1 %243 }
 0x31a   :  { %1090 = vrcp.f32 %v244_v56  ;;  %v1070_v56 = vld [vmem:[#allocation3 + $0x10] sm:$0xff]  }
 0x320   :  { %v1089_v57 = vpop.eup %1088 }
 0x324   :  { %v1091_v61 = vpop.eup %1090 }
 0x360   :  { %v284_v58 = vpop.f32.mrb[8].mxu0 }
 0x361   :  { %v293_v59 = vmul.f32 %v1089_v57, %v284_v58  ;;  %v964_v60 = vpop.f32.mrb[9].mxu0  ;;  %v1071_v57 = vld [vmem:[#allocation3 + $0x18] sm:$0xff]   ;;  %v1072_v58 = vld [vmem:[#allocation3 + $0x20] sm:$0xff]  }
 0x362   :  { %v287_v62 = vpop.f32.mrb[10].mxu0  ;;  %v1074_v60 = vld [vmem:[#allocation3 + $0x30] sm:$0xff]  }
 0x363   :  { %v294_v63 = vmul.f32 %v1091_v61, %v287_v62  ;;  %v965_v1 = vpop.f32.mrb[11].mxu0  ;;  %v295_v2 = vmax.f32 %v293_v59, 0.0  ;;  %v1073_v59 = vld [vmem:[#allocation3 + $0x28] sm:$0xff]   ;;  %v1075_v61 = vld [vmem:[#allocation3 + $0x38] sm:$0xff]   ;;  %v1076_v62 = vld [vmem:[#allocation6] sm:$0xff]  }
 0x364   :  { %v1078_v1 = vld [vmem:[#allocation6 + $0x10] sm:$0xff]  }
 0x365   :  { %v296_v3 = vmax.f32 %v294_v63, 0.0  ;;  %v1077_v63 = vld [vmem:[#allocation6 + $0x8] sm:$0xff]  }
 0x367   :  { %v301_v4 = vpack.c.bf16 %v296_v3, %v295_v2  ;;  %v1079_v2 = vld [vmem:[#allocation6 + $0x18] sm:$0xff]   ;;  %v1080_v3 = vld [vmem:[#allocation6 + $0x20] sm:$0xff]  }
 0x369   :  { %983 = vmatmul.mubr.bf16.vlgmr.msra.gmra.mrb[0].mxu1 %v301_v4  ;;  %v1081_v4 = vld [vmem:[#allocation6 + $0x28] sm:$0xff]  }
 0x36a   :  { %1041 = vmatprep.mubr.msk.bf16.mxu1 %vm1181_vm0, %v1180_v0  ;;  %1026 = vmatpush3.bf16.msra.mxu1 %v1076_v62 }
 0x36b   :  { %1027 = vmatprep.subr.bf16.mxu1 %v1180_v0 }
 0x36e   :  { %1028 = vmatpush3.bf16.msra.mxu1 %v1077_v63 }
 0x36f   :  { %1029 = vmatprep.subr.bf16.mxu1 %v1180_v0 }
 0x372   :  { %1030 = vmatpush3.bf16.msra.mxu1 %v1078_v1 }
 0x373   :  { %1031 = vmatprep.subr.bf16.mxu1 %v1180_v0 }
 0x376   :  { %1032 = vmatpush3.bf16.msra.mxu1 %v1079_v2 }
 0x377   :  { %1033 = vmatprep.subr.bf16.mxu1 %v1180_v0 }
 0x37a   :  { %1034 = vmatpush3.bf16.msra.mxu1 %v1080_v3 }
 0x37b   :  { %1035 = vmatprep.subr.bf16.mxu1 %v1180_v0 }
 0x37e   :  { %1036 = vmatpush3.bf16.msra.mxu1 %v1081_v4 }
 0x37f   :  { %1037 = vmatprep.subr.bf16.mxu1 %v1180_v0 }
 0x43c   :  { %v402_v6 = vpop.f32.mrb[0].mxu1 }
 0x43d   :  { %v984_v7 = vpop.f32.mrb[1].mxu1  ;;  %v415_v8 = vmul.f32 %v882_v5, %v402_v6 }
 0x43e   :  { %v405_v9 = vpop.f32.mrb[2].mxu1 }
 0x43f   :  { %v1049_v10 = vpack.c.bf16 %v405_v9, %v402_v6  ;;  %417 = vadd.xlane.f32.xlu0 %v415_v8  ;;  %v985_v11 = vpop.f32.mrb[3].mxu1  ;;  %v416_v12 = vmul.f32 %v882_v5, %v405_v9  ;;  %v1082_v5 = vld [vmem:[#allocation6 + $0x30] sm:$0xff]  }
 0x440   :  { %1038 = vmatpush3.bf16.msra.mxu1 %v1082_v5  ;;  %v1083_v11 = vld [vmem:[#allocation6 + $0x38] sm:$0xff]  }
 0x441   :  { %1050 = vmatpush3.bf16.xpose.msra.mxu0 %v1049_v10  ;;  %419 = vadd.xlane.f32.xlu1 %v416_v12 }
 0x442   :  { %993 = vmatprep.subr.bf16.mxu0 %v1180_v0  ;;  %1039 = vmatprep.subr.bf16.mxu1 %v1180_v0 }
 0x444   :  { %1040 = vmatpush3.bf16.msra.mxu1 %v1083_v11 }
 0x448   :  { %991 = vmatmul.mubr.f32.vlgmr.msra.gmra.mrb[6].mxu0 %v318_v13 }
 0x449   :  { %994 = vmatpush3.bf16.msra.mxu0 %v1049_v10  ;;  %995 = vmatprep.mubr.msk.bf16.mxu0 %vm1181_vm0, %v1180_v0 }
 0x44a   :  { %999 = vmatprep.subr.bf16.mxu0 %v1180_v0 }
 0x4cc   :  { %v418_v19 = vpop.xlane.xlu0 %417 }
 0x4ce   :  { %v420_v20 = vpop.xlane.xlu1 %419 }
 0x51b   :  { %v487_v14 = vpop.f32.mrb[6].mxu0 }
 0x51c   :  { %v494_v15 = vrot.slane %v487_v14, %v215_v18  ;;  %v992_v17 = vpop.f32.mrb[7].mxu0 }
 0x51e   :  { %v495_v21 = vadd.f32 %v494_v15, %v418_v19  ;;  %v496_v22 = vadd.f32 %v494_v15, %v420_v20  ;;  %v893_v20 = vld [vmem:[%s1427_s11] ss:$0 sm:$0xff]  ;;  %s860_s11 = sshll.u32 %s1183_s2, 4  ;;  %s861_s11 = int_to_ptr.vmem [resolvable:$true] %s860_s11 }
 0x51f   :  { %s1148_s0 = scalar_lea.vmem %s861_s11, 32  ;;  %p1153_p3 = scmp.lt.s32.totalorder %s861_s11, %s861_s11 }
 0x520   :  { %v497_v24 = vmul.f32 0.2, %v495_v21  ;;  %v498_v25 = vmul.f32 0.2, %v496_v22  ;;  %p1149_p2 = scmp.ne.s32.totalorder %s861_s11, %s1148_s0  ;;  %p1154_p4 = scmp.lt.s32.totalorder %s1148_s0, %s1148_s0 }
 0x522   :  { %v499_v26 = vmax.f32 %v495_v21, %v497_v24  ;;  %v500_v27 = vmax.f32 %v496_v22, %v498_v25  ;;  %p1155_p5 = por %p1154_p4, %p1153_p3 }
 0x524   :  { %v501_v29 = vadd.f32 %v904_v28, %v499_v26  ;;  %v502_v31 = vadd.f32 %v905_v30, %v500_v27  ;;  %p1156_p6 = pnand %p1155_p5, %p1149_p2 }
 0x526   :  { %v503_v32 = vsel %vm86_vm1, %v501_v29, -inf  ;;  %v506_v16 = vsel %vm86_vm1, %v502_v31, -inf }
 0x527   :  { %504 = vmax.xlane.f32.xlu0 %v503_v32  ;;  %507 = vmax.xlane.f32.xlu1 %v506_v16 }
 0x5b4   :  { %v505_v18 = vpop.xlane.xlu0 %504  ;;  %v508_v33 = vpop.xlane.xlu1 %507 }
 0x5b5   :  { %v509_v34 = vsub.f32 %v501_v29, %v505_v18  ;;  %v510_v35 = vsub.f32 %v502_v31, %v508_v33 }
 0x5b7   :  { %v511_v36 = vmul.f32 1.442695, %v509_v34  ;;  %v513_v37 = vmul.f32 1.442695, %v510_v35 }
 0x5b9   :  { %1092 = vpow2.f32 %v511_v36 }
 0x5ba   :  { %1094 = vpow2.f32 %v513_v37 }
 0x5c3   :  { %v1093_v38 = vpop.eup %1092 }
 0x5c4   :  { %v1095_v39 = vpop.eup %1094  ;;  %v515_v28 = vsel %vm86_vm1, %v1093_v38, 0.0 }
 0x5c5   :  { %516 = vadd.xlane.f32.xlu0 %v515_v28  ;;  %v518_v23 = vsel %vm86_vm1, %v1095_v39, 0.0  ;;  %v521_v30 = vpack.c.bf16 %v1095_v39, %v1093_v38 }
 0x5c6   :  { %519 = vadd.xlane.f32.xlu1 %v518_v23 }
 0x5c7   :  { %996 = vmatmul.mubr.msk.bf16.vlgmr.msra.gmra.mrb[12].mxu0 %vm86_vm1, %v521_v30 }
 0x5c8   :  { %1001 = vmatprep.mubr.msk.bf16.mxu0 %vm1181_vm0, %v1180_v0 }
 0x652   :  { %v517_v40 = vpop.xlane.xlu0 %516 }
 0x653   :  { %v520_v41 = vpop.xlane.xlu1 %519  ;;  %1096 = vrcp.f32 %v517_v40 }
 0x654   :  { %1098 = vrcp.f32 %v520_v41 }
 0x65d   :  { %v1097_v42 = vpop.eup %1096 }
 0x65e   :  { %v1099_v46 = vpop.eup %1098 }
 0x69a   :  { %v560_v43 = vpop.f32.mrb[12].mxu0 }
 0x69b   :  { %v569_v44 = vmul.f32 %v1097_v42, %v560_v43  ;;  %v997_v45 = vpop.f32.mrb[13].mxu0 }
 0x69c   :  { %v563_v47 = vpop.f32.mrb[14].mxu0 }
 0x69d   :  { %v570_v48 = vmul.f32 %v1099_v46, %v563_v47  ;;  %v998_v49 = vpop.f32.mrb[15].mxu0  ;;  %v571_v50 = vmax.f32 %v569_v44, 0.0 }
 0x69f   :  { %v572_v51 = vmax.f32 %v570_v48, 0.0 }
 0x6a1   :  { %v578_v52 = vpack.c.bf16 %v572_v51, %v571_v50 }
 0x6a3   :  { %1000 = vmatpush3.bf16.msra.mxu0 %v578_v52 }
 0x6a4   :  { %1005 = vmatprep.subr.bf16.mxu0 %v1180_v0 }
 0x6a6   :  { %1002 = vmatmul.mubr.msk.bf16.vlgmr.msra.gmra.mrb[16].mxu0 %vm86_vm1, %v575_v53 }
 0x6a7   :  { %1006 = vmatpush3.bf16.msra.mxu0 %v1068_v54  ;;  %1021 = vmatprep.mubr.msk.bf16.mxu0 %vm1181_vm0, %v1180_v0 }
 0x6a8   :  { %1007 = vmatprep.subr.bf16.mxu0 %v1180_v0 }
 0x6ab   :  { %1008 = vmatpush3.bf16.msra.mxu0 %v1069_v55 }
 0x6ac   :  { %1009 = vmatprep.subr.bf16.mxu0 %v1180_v0 }
 0x6af   :  { %1010 = vmatpush3.bf16.msra.mxu0 %v1070_v56 }
 0x6b0   :  { %1011 = vmatprep.subr.bf16.mxu0 %v1180_v0 }
 0x6b3   :  { %1012 = vmatpush3.bf16.msra.mxu0 %v1071_v57 }
 0x6b4   :  { %1013 = vmatprep.subr.bf16.mxu0 %v1180_v0 }
 0x6b7   :  { %1014 = vmatpush3.bf16.msra.mxu0 %v1072_v58 }
 0x6b8   :  { %1015 = vmatprep.subr.bf16.mxu0 %v1180_v0 }
 0x6bb   :  { %1016 = vmatpush3.bf16.msra.mxu0 %v1073_v59 }
 0x6bc   :  { %1017 = vmatprep.subr.bf16.mxu0 %v1180_v0 }
 0x6bf   :  { %1018 = vmatpush3.bf16.msra.mxu0 %v1074_v60 }
 0x6c0   :  { %1019 = vmatprep.subr.bf16.mxu0 %v1180_v0 }
 0x6c3   :  { %1020 = vmatpush3.bf16.msra.mxu0 %v1075_v61 }
 0x779   :  { %v616_v6 = vpop.f32.mrb[16].mxu0 }
 0x77a   :  { %v622_v7 = vpack.c.bf16 %v616_v6, %v616_v6  ;;  %v1003_v8 = vpop.f32.mrb[17].mxu0 }
 0x77b   :  { %v619_v9 = vpop.f32.mrb[18].mxu0 }
 0x77c   :  { %1022 = vmatmul.mubr.bf16.vlgmr.msra.gmra.mrb[20].mxu0 %v622_v7  ;;  %v1004_v10 = vpop.f32.mrb[19].mxu0 }
 0x84f   :  { %v721_v12 = vpop.f32.mrb[20].mxu0 }
 0x850   :  { %v727_v13 = vmax.f32 %v721_v12, 0.0  ;;  %v1023_v14 = vpop.f32.mrb[21].mxu0 }
 0x851   :  { %v724_v15 = vpop.f32.mrb[22].mxu0 }
 0x852   :  { %v728_v17 = vpack.c.bf16 %v727_v13, %v727_v13  ;;  %v1024_v19 = vpop.f32.mrb[23].mxu0 }
 0x854   :  { %1042 = vmatmul.mubr.bf16.vlgmr.msra.gmra.mrb[4].mxu1 %v728_v17 }
 0x927   :  { %v834_v0 = vpop.f32.mrb[4].mxu1 }
 0x928   :  { %v835_v21 = vadd.f32 %v893_v20, %v834_v0  ;;  %v1043_v22 = vpop.f32.mrb[5].mxu1 }
 0x929   :  { %v837_v24 = vpop.f32.mrb[6].mxu1 }
 0x92a   :  { %v841_v25 = vsel %vm840_vm2, %v835_v21, -inf  ;;  %v1044_v26 = vpop.f32.mrb[7].mxu1 }
 0x92b   :  { %842 = vmax.xlane.f32.xlu0 %v841_v25 }
 0x9b8   :  { %v843_v27 = vpop.xlane.xlu0 %842 }
 0x9b9   :  { %v844_v29 = vsub.f32 %v835_v21, %v843_v27 }
 0x9bb   :  { %v845_v31 = vmul.f32 1.442695, %v844_v29 }
 0x9bd   :  { %1100 = vpow2.f32 %v845_v31 }
 0x9c7   :  { %v1101_v32 = vpop.eup %1100 }
 0x9c8   :  { %v847_v16 = vsel %vm840_vm2, %v1101_v32, 0.0 }
 0x9c9   :  { %848 = vadd.xlane.f32.xlu1 %v847_v16 }
 0xa56   :  { %v849_v18 = vpop.xlane.xlu1 %848 }
 0xa57   :  { %1102 = vlog2.f32 %v849_v18 }
 0xa61   :  { %v1103_v33 = vpop.eup %1102 }
 0xa62   :  { %v851_v34 = vmul.f32 0.6931472, %v1103_v33 }
 0xa64   :  { %v852_v35 = vsub.f32 %v844_v29, %v851_v34 }
 0xa66   :  { %853 = vst [vmem:[#allocation8] sm:$0x3] %v852_v35 }
 0xa67   :  { %1159 = shalt.err (!%p1156_p6)
}
 0xa68   :  { %s1160_s3 = scalar_lea.hbm %s1428_s12, 32 }
 0xa69   :  { %p1161_p7 = scmp.ne.s32.totalorder %s1428_s12, %s1160_s3  ;;  %p1164_p8 = scmp.lt.u32.totalorder %s1160_s3, %s1428_s12 }
 0xa6b   :  { %p1166_p9 = pnand %p1164_p8, %p1161_p7 }
 0xa6d   :  { %1169 = shalt.err (!%p1166_p9)
}
 0xa6e   :  { %863 = dma.vmem_to_hbm [thread:$0]  %s861_s11, 32, %s1428_s12, [#allocation5]  }
 0xa6f   :  { %1174 = dma.done.wait [#allocation5], 32  }
 0xa70   :  { %1175 = vsyncadd [#allocation5], 4294967264 }
 0xa71   :  { %867 = vsyncpa [#allocation4], 1 }
 0xa72   :  { %868 = vsyncpa [#allocation7], 1 }
 0xa73   :  { %869 = vsyncpa [#allocation5], 1 }

</bundles_post_ra>
